<compile_context>
chip_gen: v7x
topology: tpu7x:2x2x1
jax: 0.10.0
libtpu: 0.0.40
codegen_flags: <defaults>
</compile_context>

<pallas_src>
import functools

import jax
import jax.numpy as jnp
from jax.experimental import pallas as pl
from jax.experimental.pallas import tpu as pltpu

# Safe on every current TPU generation (v5e default scoped is 16 MiB, v7x has
# only 64 MiB physical VMEM); raise per-chip if larger row tiles are wanted.
_VMEM_LIMIT_BYTES = 32 * 1024 * 1024


def _round_up(x, m):
    return (x + m - 1) // m * m


def _pad2(m, rows, cols):
    r, c = m.shape
    return jnp.pad(m, ((0, rows - r), (0, cols - c)))


# -----------------------------------------------------------------------------
# Kernel 1: row-tiled dense matmul   XW = X @ W     (W resident in VMEM)
# -----------------------------------------------------------------------------
def _xw_kernel(x_ref, w_ref, o_ref):
    o_ref[...] = jnp.dot(
        x_ref[...], w_ref[...], preferred_element_type=jnp.float32
    ).astype(o_ref.dtype)


def _tiled_matmul(x, w, *, tn, out_dtype):
    n, k = x.shape
    _, f = w.shape
    bytes_accessed = int(
        (n * k + k * f) * x.dtype.itemsize + n * f * jnp.dtype(out_dtype).itemsize
    )
    return pl.pallas_call(
        _xw_kernel,
        out_shape=jax.ShapeDtypeStruct((n, f), out_dtype),
        grid_spec=pltpu.PrefetchScalarGridSpec(
            num_scalar_prefetch=0,
            grid=(n // tn,),
            in_specs=[
                pl.BlockSpec((tn, k), lambda i: (i, 0)),  # X row slab (pipelined)
                pl.BlockSpec((k, f), lambda i: (0, 0)),   # W resident
            ],
            out_specs=pl.BlockSpec((tn, f), lambda i: (i, 0)),
        ),
        compiler_params=pltpu.CompilerParams(
            dimension_semantics=("parallel",),
            vmem_limit_bytes=_VMEM_LIMIT_BYTES,
        ),
        cost_estimate=pl.CostEstimate(
            flops=2 * n * k * f, transcendentals=0, bytes_accessed=bytes_accessed
        ),
    )(x, w)


# -----------------------------------------------------------------------------
# Kernel 2: row + K tiled aggregation   Y = A_hat @ XW + b   (optional ReLU)
#   grid = (row_tiles, k_tiles); k is the LAST ("arbitrary") axis with an f32
#   VMEM accumulator; rows are "parallel" (megacore sharding on v7x).
# -----------------------------------------------------------------------------
def _agg_kernel(a_ref, xw_ref, b_ref, o_ref, acc_ref, *, apply_relu):
    k = pl.program_id(1)

    @pl.when(k == 0)
    def _init():
        acc_ref[...] = jnp.zeros_like(acc_ref)

    acc_ref[...] += jnp.dot(
        a_ref[...], xw_ref[...], preferred_element_type=jnp.float32
    )

    @pl.when(k == pl.num_programs(1) - 1)
    def _finalize():
        y = acc_ref[...] + b_ref[...]  # (TN, F) + (1, F) broadcast, b read once
        if apply_relu:
            y = jnp.maximum(y, 0.0)
        o_ref[...] = y.astype(o_ref.dtype)


def _tiled_aggregate(a, xw, b, *, tn, tk, apply_relu, out_dtype):
    n = a.shape[0]
    f = xw.shape[1]
    bytes_accessed = int(
        a.size * a.dtype.itemsize
        + xw.size * xw.dtype.itemsize
        + b.size * b.dtype.itemsize
        + n * f * jnp.dtype(out_dtype).itemsize
    )
    kernel = functools.partial(_agg_kernel, apply_relu=apply_relu)
    return pl.pallas_call(
        kernel,
        out_shape=jax.ShapeDtypeStruct((n, f), out_dtype),
        grid_spec=pltpu.PrefetchScalarGridSpec(
            num_scalar_prefetch=0,
            grid=(n // tn, n // tk),
            in_specs=[
                pl.BlockSpec((tn, tk), lambda i, k: (i, k)),  # A slab (pipelined)
                pl.BlockSpec((tk, f), lambda i, k: (k, 0)),   # XW K-slab
                pl.BlockSpec((1, f), lambda i, k: (0, 0)),    # bias resident
            ],
            out_specs=pl.BlockSpec((tn, f), lambda i, k: (i, 0)),
            scratch_shapes=[pltpu.VMEM((tn, f), jnp.float32)],
        ),
        compiler_params=pltpu.CompilerParams(
            dimension_semantics=("parallel", "arbitrary"),
            vmem_limit_bytes=_VMEM_LIMIT_BYTES,
        ),
        cost_estimate=pl.CostEstimate(
            flops=2 * n * n * f, transcendentals=0, bytes_accessed=bytes_accessed
        ),
    )(a, xw, b)


# -----------------------------------------------------------------------------
# ODIN forward (GCN encoder, eval mode)
# -----------------------------------------------------------------------------
def odin_forward(a_hat, x, w1, b1, w2, b2, *, compute_dtype=jnp.bfloat16,
                 row_tile=256):
    """Y = A_hat @ relu(A_hat @ (X @ W1) + b1) @ W2-chain, via Pallas kernels."""
    n, d = x.shape
    h = w1.shape[1]
    c = w2.shape[1]

    # Pad lane dims to 128 (vreg / MXU width) and the node dim to the row tile.
    dp = _round_up(d, 128)
    hp = _round_up(h, 128)
    cp = _round_up(c, 128)
    tn = min(row_tile, _round_up(n, 128))
    np_ = _round_up(n, tn)
    tk = tn  # column tile of A (contraction axis of the aggregate matmul)

    a_p = _pad2(a_hat, np_, np_).astype(compute_dtype)
    x_p = _pad2(x, np_, dp).astype(compute_dtype)
    w1_p = _pad2(w1, dp, hp).astype(compute_dtype)
    w2_p = _pad2(w2, hp, cp).astype(compute_dtype)
    b1_p = _pad2(b1, 1, hp).astype(jnp.float32)
    b2_p = _pad2(b2, 1, cp).astype(jnp.float32)

    # ----- layer 1: GCNConv + ReLU -----
    xw1 = _tiled_matmul(x_p, w1_p, tn=tn, out_dtype=compute_dtype)
    h1 = _tiled_aggregate(a_p, xw1, b1_p, tn=tn, tk=tk, apply_relu=True,
                          out_dtype=compute_dtype)
    # TODO(synk): dropout is a no-op in eval mode; use_bn=False so no BatchNorm.

    # ----- layer 2: GCNConv (logits, no activation) -----
    xw2 = _tiled_matmul(h1, w2_p, tn=tn, out_dtype=compute_dtype)
    y = _tiled_aggregate(a_p, xw2, b2_p, tn=tn, tk=tk, apply_relu=False,
                         out_dtype=jnp.float32)

    return y[:n, :c]


# -----------------------------------------------------------------------------
# Plain-JAX glue
# -----------------------------------------------------------------------------
def normalized_adjacency(edge_index, num_nodes):
    """A_hat = D^{-1/2} (A + I) D^{-1/2}  (GCNConv with add_self_loops=True)."""
    src, dst = edge_index
    a = jnp.zeros((num_nodes, num_nodes), jnp.float32)
    a = a.at[dst, src].set(1.0)  # messages flow src -> dst
    a = a + jnp.eye(num_nodes, dtype=jnp.float32)
    deg = jnp.sum(a, axis=1)
    d_inv_sqrt = jnp.where(deg > 0, 1.0 / jnp.sqrt(deg), 0.0)
    return d_inv_sqrt[:, None] * a * d_inv_sqrt[None, :]


def glorot(key, shape):
    fan_in, fan_out = shape
    limit = jnp.sqrt(6.0 / (fan_in + fan_out))
    return jax.random.uniform(key, shape, jnp.float32, -limit, limit)


def init_params(key, d, hidden, c):
    k1, k2 = jax.random.split(key)
    w1 = glorot(k1, (d, hidden))
    b1 = jnp.zeros((1, hidden), jnp.float32)
    w2 = glorot(k2, (hidden, c))
    b2 = jnp.zeros((1, c), jnp.float32)
    return w1, b1, w2, b2


def reference_forward(a_hat, x, w1, b1, w2, b2):
    h1 = jnp.maximum(a_hat @ (x @ w1) + b1, 0.0)
    return a_hat @ (h1 @ w2) + b2


if __name__ == "__main__":
    # Small, deterministic problem: N=16 nodes, d=8 features, hidden=32, c=4.
    N, D, HIDDEN, C = 16, 8, 32, 4

    key = jax.random.PRNGKey(0)
    k_x, k_p = jax.random.split(key)

    # Node features (dataset.x analogue).
    x = jax.random.normal(k_x, (N, D), jnp.float32)

    # Deterministic ring graph (undirected) as edge_index [2, E].
    src = jnp.arange(N, dtype=jnp.int32)
    dst = (src + 1) % N
    edge_index = jnp.stack(
        [jnp.concatenate([src, dst]), jnp.concatenate([dst, src])], axis=0
    )

    a_hat = normalized_adjacency(edge_index, N)
    w1, b1, w2, b2 = init_params(k_p, D, HIDDEN, C)

    ref = reference_forward(a_hat, x, w1, b1, w2, b2)

    # f32 path: tight numerical check against the plain-JAX reference.
    logits_f32 = odin_forward(a_hat, x, w1, b1, w2, b2,
                              compute_dtype=jnp.float32)
    logits_f32 = jax.block_until_ready(logits_f32)
    assert logits_f32.shape == (N, C)
    assert jnp.allclose(logits_f32, ref, atol=1e-4, rtol=1e-4), "f32 mismatch"

    # bf16 path (production setting per perf review): loose tolerance.
    logits_bf16 = odin_forward(a_hat, x, w1, b1, w2, b2,
                               compute_dtype=jnp.bfloat16)
    logits_bf16 = jax.block_until_ready(logits_bf16)
    assert logits_bf16.shape == (N, C)
    assert jnp.allclose(logits_bf16, ref, atol=5e-2, rtol=5e-2), "bf16 mismatch"

    print("KERNEL_OK")
</pallas_src>

<mosaic_0001>
module attributes {stable_mosaic.version = 11 : i64} {
  func.func @_xw_kernel(%arg0: i32, %arg1: memref<128x128xf32, #tpu.memory_space<vmem>>, %arg2: memref<128x128xf32, #tpu.memory_space<vmem>>, %arg3: memref<128x128xf32, #tpu.memory_space<vmem>>) attributes {dimension_semantics = [#tpu.dimension_semantics<parallel>], iteration_bounds = array<i64: 1>, scalar_prefetch = 0 : i64, scratch_operands = 0 : i64, tpu.core_type = #tpu.core_type<tc>, window_params = [{transform_indices = @transform_0, window_bounds = array<i64: 128, 128>}, {pipeline_mode = #tpu.pipeline_mode<synchronous>, transform_indices = @transform_1, window_bounds = array<i64: 128, 128>}, {transform_indices = @transform_2, window_bounds = array<i64: 128, 128>}]} {
    %c0 = arith.constant 0 : index
    %c0_0 = arith.constant 0 : index
    %0 = vector.load %arg1[%c0, %c0_0] : memref<128x128xf32, #tpu.memory_space<vmem>>, vector<128x128xf32>
    %c0_1 = arith.constant 0 : index
    %c0_2 = arith.constant 0 : index
    %1 = vector.load %arg2[%c0_1, %c0_2] : memref<128x128xf32, #tpu.memory_space<vmem>>, vector<128x128xf32>
    %cst = arith.constant dense<0.000000e+00> : vector<128x128xf32>
    %2 = tpu.matmul %0, %1, %cst {dimension_numbers = #tpu.dot_dimension_numbers<[1], [0], [0], [1], [0, 0, 1, 1], [], []>} : vector<128x128xf32>, vector<128x128xf32>, vector<128x128xf32> -> vector<128x128xf32>
    %c0_3 = arith.constant 0 : index
    %c0_4 = arith.constant 0 : index
    %3 = vector.load %arg3[%c0_3, %c0_4] : memref<128x128xf32, #tpu.memory_space<vmem>>, vector<128x128xf32>
    tpu.vector_store %arg3[%c0_3, %c0_4], %2 {strides = array<i32>} : memref<128x128xf32, #tpu.memory_space<vmem>>, vector<128x128xf32>,
    return
  }
  func.func @transform_0(%arg0: i32) -> (i32, i32) {
    %c0_i32 = arith.constant 0 : i32
    %c0_i32_0 = arith.constant 0 : i32
    return %arg0, %c0_i32 : i32, i32
  }
  func.func @transform_1(%arg0: i32) -> (i32, i32) {
    %c0_i32 = arith.constant 0 : i32
    %c0_i32_0 = arith.constant 0 : i32
    %c0_i32_1 = arith.constant 0 : i32
    return %c0_i32, %c0_i32_0 : i32, i32
  }
  func.func @transform_2(%arg0: i32) -> (i32, i32) {
    %c0_i32 = arith.constant 0 : i32
    %c0_i32_0 = arith.constant 0 : i32
    return %arg0, %c0_i32 : i32, i32
  }
}

</mosaic_0001>

<bundles_post_ra>
// kernel: tpu_custom_call.1
= control target key start
LH: loop header
LB: loop body
LE: loop exit
PB: predicated region body
PF: predicated region fallthrough
CT: control target
= control target key end

     0   :  { %7 = vsyncpa [#allocation3], 0  ;;  %s529_s0 = inlined_call_operand.hbm [shape: f32[128,128], index: 0, kind: input, shape index: {}]   ;;  %s530_s1 = inlined_call_operand.hbm [shape: f32[128,128], index: 1, kind: input, shape index: {}]   ;;  %s531_s2 = inlined_call_operand.hbm [shape: f32[128,128], index: 2, kind: output, shape index: {}]  }
   0x1   :  { %8 = vsyncpa [#allocation6], 0 }
   0x2   :  { %9 = vsyncpa [#allocation4], 0  ;;  %s464_s9 = smov [#allocation2]   ;;  %s392_s13 = scalar_lea.hbm %s529_s0, 2048 }
   0x3   :  { %s15_s10 = sshll.u32 %s464_s9, 4  ;;  %p393_p0 = scmp.ne.s32.totalorder %s529_s0, %s392_s13  ;;  %s16_s10 = int_to_ptr.vmem [resolvable:$true] %s15_s10 }
   0x4   :  { %p396_p1 = scmp.lt.u32.totalorder %s392_s13, %s529_s0 }
   0x6   :  { %p398_p2 = pnand %p396_p1, %p393_p0 }
   0x8   :  { %401 = shalt.err (!%p398_p2)
}
   0x9   :  { %s402_s18 = scalar_lea.vmem %s16_s10, 2048  ;;  %p407_p4 = scmp.lt.s32.totalorder %s16_s10, %s16_s10 }
   0xa   :  { %p403_p3 = scmp.ne.s32.totalorder %s16_s10, %s402_s18  ;;  %p408_p5 = scmp.lt.s32.totalorder %s402_s18, %s402_s18 }
   0xc   :  { %p409_p6 = por %p408_p5, %p407_p4 }
   0xe   :  { %p410_p7 = pnand %p409_p6, %p403_p3 }
  0x10   :  { %413 = shalt.err (!%p410_p7)
}
  0x11   :  { %s465_s19 = smov 128   ;;  %s466_s20 = smov 8  }
  0x12   :  { %21 = dma.hbm_to_vmem [thread:$0]  %s529_s0, 2048, %s16_s10, [#allocation3], %s465_s19, %s465_s19, %s466_s20  }
  0x13   :  { %s467_s23 = smov [#allocation5]   ;;  %s414_s27 = scalar_lea.hbm %s530_s1, 2048 }
  0x14   :  { %s27_s24 = sshll.u32 %s467_s23, 4  ;;  %p415_p8 = scmp.ne.s32.totalorder %s530_s1, %s414_s27  ;;  %s28_s24 = int_to_ptr.vmem [resolvable:$true] %s27_s24 }
  0x15   :  { %p418_p9 = scmp.lt.u32.totalorder %s414_s27, %s530_s1 }
  0x17   :  { %p420_p10 = pnand %p418_p9, %p415_p8 }
  0x19   :  { %423 = shalt.err (!%p420_p10)
}
  0x1a   :  { %s424_s4 = scalar_lea.vmem %s28_s24, 2048  ;;  %p429_p12 = scmp.lt.s32.totalorder %s28_s24, %s28_s24 }
  0x1b   :  { %p425_p11 = scmp.ne.s32.totalorder %s28_s24, %s424_s4  ;;  %p430_p13 = scmp.lt.s32.totalorder %s424_s4, %s424_s4 }
  0x1d   :  { %p431_p0 = por %p430_p13, %p429_p12 }
  0x1f   :  { %p432_p1 = pnand %p431_p0, %p425_p11 }
  0x21   :  { %435 = shalt.err (!%p432_p1)
}
  0x22   :  { %33 = dma.hbm_to_vmem [thread:$0]  %s530_s1, 2048, %s28_s24, [#allocation6], %s465_s19, %s465_s19, %s466_s20  }
  0x23   :  { %458 = dma.done.wait [#allocation3], 2048  }
  0x24   :  { %459 = vsyncadd [#allocation3], 4294965248 }
  0x25   :  { %460 = dma.done.wait [#allocation6], 2048  }
  0x26   :  { %461 = vsyncadd [#allocation6], 4294965248  ;;  %v56_v0 = vld [vmem:[#allocation5] sm:$0xff]  ;;  %v57_v1 = vld [vmem:[#allocation5 + $0x8] sm:$0xff]  ;;  %s468_s1 = smov [#allocation7]  }
  0x27   :  { %v58_v2 = vld [vmem:[#allocation5 + $0x10] sm:$0xff]  ;;  %v339_v3 = vpack.c.bf16 %v57_v1, %v56_v0  ;;  %v59_v4 = vld [vmem:[#allocation5 + $0x18] sm:$0xff]  ;;  %v60_v6 = vld [vmem:[#allocation5 + $0x20] sm:$0xff]  ;;  %s238_s6 = sshll.u32 %s468_s1, 4  ;;  %s239_s6 = int_to_ptr.vmem [resolvable:$true] %s238_s6 }
  0x28   :  { %v343_v5 = vpack.c.bf16 %v59_v4, %v58_v2  ;;  %v61_v7 = vld [vmem:[#allocation5 + $0x28] sm:$0xff]  ;;  %v40_v9 = vld [vmem:[#allocation2] sm:$0xff]  ;;  %v62_v11 = vld [vmem:[#allocation5 + $0x30] sm:$0xff]  ;;  %s436_s7 = scalar_lea.vmem %s239_s6, 2048  ;;  %p441_p3 = scmp.lt.s32.totalorder %s239_s6, %s239_s6 }
  0x29   :  { %340 = vmatprep.subr.bf16.mxu0 %v339_v3  ;;  %371 = vmatprep.subr.bf16.mxu1 %v339_v3  ;;  %v347_v8 = vpack.c.bf16 %v61_v7, %v60_v6  ;;  %v48_v10 = vld [vmem:[#allocation2 + $0x40] sm:$0xff]  ;;  %v63_v12 = vld [vmem:[#allocation5 + $0x38] sm:$0xff]  ;;  %v65_v15 = vld [vmem:[#allocation5 + $0x48] sm:$0xff]  ;;  %p437_p2 = scmp.ne.s32.totalorder %s239_s6, %s436_s7  ;;  %p442_p4 = scmp.lt.s32.totalorder %s436_s7, %s436_s7 }
  0x2a   :  { %342 = vmatpush3.bf16.msra.mxu0 %v339_v3  ;;  %379 = vmatpush3.bf16.msra.mxu1 %v339_v3  ;;  %v351_v13 = vpack.c.bf16 %v63_v12, %v62_v11  ;;  %v64_v14 = vld [vmem:[#allocation5 + $0x40] sm:$0xff]  ;;  %v66_v17 = vld [vmem:[#allocation5 + $0x50] sm:$0xff]  ;;  %v67_v18 = vld [vmem:[#allocation5 + $0x58] sm:$0xff] }
  0x2b   :  { %344 = vmatprep.subr.bf16.mxu0 %v343_v5  ;;  %372 = vmatprep.subr.bf16.mxu1 %v343_v5  ;;  %v355_v16 = vpack.c.bf16 %v65_v15, %v64_v14  ;;  %v359_v19 = vpack.c.bf16 %v67_v18, %v66_v17  ;;  %v68_v20 = vld [vmem:[#allocation5 + $0x60] sm:$0xff]  ;;  %v69_v21 = vld [vmem:[#allocation5 + $0x68] sm:$0xff]  ;;  %v70_v23 = vld [vmem:[#allocation5 + $0x70] sm:$0xff]  ;;  %p443_p5 = por %p442_p4, %p441_p3 }
  0x2c   :  { %315 = vmatprep.mubr.f32.mxu0 %v40_v9  ;;  %327 = vmatprep.mubr.f32.mxu1 %v48_v10  ;;  %v363_v22 = vpack.c.bf16 %v69_v21, %v68_v20  ;;  %v71_v24 = vld [vmem:[#allocation5 + $0x78] sm:$0xff]  ;;  %v41_v26 = vld [vmem:[#allocation2 + $0x8] sm:$0xff]  ;;  %v42_v28 = vld [vmem:[#allocation2 + $0x10] sm:$0xff] }
  0x2d   :  { %v367_v25 = vpack.c.bf16 %v71_v24, %v70_v23  ;;  %v49_v27 = vld [vmem:[#allocation2 + $0x48] sm:$0xff]  ;;  %v50_v29 = vld [vmem:[#allocation2 + $0x50] sm:$0xff]  ;;  %v43_v30 = vld [vmem:[#allocation2 + $0x18] sm:$0xff]  ;;  %p444_p6 = pnand %p443_p5, %p437_p2 }
  0x2e   :  { %346 = vmatpush3.bf16.msra.mxu0 %v343_v5  ;;  %380 = vmatpush3.bf16.msra.mxu1 %v343_v5  ;;  %v51_v31 = vld [vmem:[#allocation2 + $0x58] sm:$0xff]  ;;  %v44_v32 = vld [vmem:[#allocation2 + $0x20] sm:$0xff]  ;;  %v45_v34 = vld [vmem:[#allocation2 + $0x28] sm:$0xff] }
  0x2f   :  { %348 = vmatprep.subr.bf16.mxu0 %v347_v8  ;;  %373 = vmatprep.subr.bf16.mxu1 %v347_v8  ;;  %v52_v33 = vld [vmem:[#allocation2 + $0x60] sm:$0xff]  ;;  %v53_v35 = vld [vmem:[#allocation2 + $0x68] sm:$0xff]  ;;  %v46_v36 = vld [vmem:[#allocation2 + $0x30] sm:$0xff] }
  0x30   :  { %v54_v37 = vld [vmem:[#allocation2 + $0x70] sm:$0xff]  ;;  %v47_v38 = vld [vmem:[#allocation2 + $0x38] sm:$0xff] }
  0x31   :  { %v55_v39 = vld [vmem:[#allocation2 + $0x78] sm:$0xff] }
  0x32   :  { %350 = vmatpush3.bf16.msra.mxu0 %v347_v8  ;;  %381 = vmatpush3.bf16.msra.mxu1 %v347_v8 }
  0x33   :  { %352 = vmatprep.subr.bf16.mxu0 %v351_v13  ;;  %374 = vmatprep.subr.bf16.mxu1 %v351_v13 }
  0x36   :  { %354 = vmatpush3.bf16.msra.mxu0 %v351_v13  ;;  %382 = vmatpush3.bf16.msra.mxu1 %v351_v13 }
  0x37   :  { %356 = vmatprep.subr.bf16.mxu0 %v355_v16  ;;  %375 = vmatprep.subr.bf16.mxu1 %v355_v16 }
  0x3a   :  { %358 = vmatpush3.bf16.msra.mxu0 %v355_v16  ;;  %383 = vmatpush3.bf16.msra.mxu1 %v355_v16 }
  0x3b   :  { %360 = vmatprep.subr.bf16.mxu0 %v359_v19  ;;  %376 = vmatprep.subr.bf16.mxu1 %v359_v19 }
  0x3e   :  { %362 = vmatpush3.bf16.msra.mxu0 %v359_v19  ;;  %384 = vmatpush3.bf16.msra.mxu1 %v359_v19 }
  0x3f   :  { %364 = vmatprep.subr.bf16.mxu0 %v363_v22  ;;  %377 = vmatprep.subr.bf16.mxu1 %v363_v22 }
  0x42   :  { %366 = vmatpush3.bf16.msra.mxu0 %v363_v22  ;;  %385 = vmatpush3.bf16.msra.mxu1 %v363_v22 }
  0x43   :  { %368 = vmatprep.subr.bf16.mxu0 %v367_v25  ;;  %378 = vmatprep.subr.bf16.mxu1 %v367_v25 }
  0x46   :  { %370 = vmatpush3.bf16.msra.mxu0 %v367_v25  ;;  %386 = vmatpush3.bf16.msra.mxu1 %v367_v25 }
  0x49   :  { %316 = vmatmul.mubr.f32.vlgmr.msra.gmra.mrb[0].mxu0 %v41_v26  ;;  %328 = vmatmul.mubr.f32.vlgmr.msra.gmra.mrb[0].mxu1 %v49_v27 }
  0x4a   :  { %318 = vmatprep.mubr.f32.mxu0 %v42_v28  ;;  %330 = vmatprep.mubr.f32.mxu1 %v50_v29 }
  0x4d   :  { %319 = vmatmul.mubr.f32.gmra.mrb[2].mxu0 %v43_v30  ;;  %331 = vmatmul.mubr.f32.gmra.mrb[2].mxu1 %v51_v31 }
  0x4e   :  { %321 = vmatprep.mubr.f32.mxu0 %v44_v32  ;;  %333 = vmatprep.mubr.f32.mxu1 %v52_v33 }
  0x51   :  { %322 = vmatmul.mubr.f32.gmra.mrb[4].mxu0 %v45_v34  ;;  %334 = vmatmul.mubr.f32.gmra.mrb[4].mxu1 %v53_v35 }
  0x52   :  { %324 = vmatprep.mubr.f32.mxu0 %v46_v36  ;;  %336 = vmatprep.mubr.f32.mxu1 %v54_v37 }
  0x55   :  { %325 = vmatmul.mubr.f32.gmra.mrb[6].mxu0 %v47_v38  ;;  %337 = vmatmul.mubr.f32.gmra.mrb[6].mxu1 %v55_v39 }
 0x11c   :  { %v317_v40 = vpop.f32.mrb[0].mxu0  ;;  %v329_v41 = vpop.f32.mrb[0].mxu1 }
 0x11d   :  { %218 = vst [vmem:[#allocation7 + $0x8] sm:$0xff] %v317_v40  ;;  %226 = vst [vmem:[#allocation7 + $0x48] sm:$0xff] %v329_v41  ;;  %v138_v42 = vpop.f32.mrb[1].mxu0  ;;  %v178_v43 = vpop.f32.mrb[1].mxu1 }
 0x11e   :  { %217 = vst [vmem:[#allocation7] sm:$0xff] %v138_v42  ;;  %225 = vst [vmem:[#allocation7 + $0x40] sm:$0xff] %v178_v43 }
 0x120   :  { %v320_v44 = vpop.f32.mrb[2].mxu0  ;;  %v332_v45 = vpop.f32.mrb[2].mxu1 }
 0x121   :  { %220 = vst [vmem:[#allocation7 + $0x18] sm:$0xff] %v320_v44  ;;  %228 = vst [vmem:[#allocation7 + $0x58] sm:$0xff] %v332_v45  ;;  %v148_v46 = vpop.f32.mrb[3].mxu0  ;;  %v188_v47 = vpop.f32.mrb[3].mxu1 }
 0x122   :  { %219 = vst [vmem:[#allocation7 + $0x10] sm:$0xff] %v148_v46  ;;  %227 = vst [vmem:[#allocation7 + $0x50] sm:$0xff] %v188_v47 }
 0x124   :  { %v323_v48 = vpop.f32.mrb[4].mxu0  ;;  %v335_v49 = vpop.f32.mrb[4].mxu1 }
 0x125   :  { %222 = vst [vmem:[#allocation7 + $0x28] sm:$0xff] %v323_v48  ;;  %230 = vst [vmem:[#allocation7 + $0x68] sm:$0xff] %v335_v49  ;;  %v158_v50 = vpop.f32.mrb[5].mxu0  ;;  %v198_v51 = vpop.f32.mrb[5].mxu1 }
 0x126   :  { %221 = vst [vmem:[#allocation7 + $0x20] sm:$0xff] %v158_v50  ;;  %229 = vst [vmem:[#allocation7 + $0x60] sm:$0xff] %v198_v51 }
 0x128   :  { %v326_v52 = vpop.f32.mrb[6].mxu0  ;;  %v338_v53 = vpop.f32.mrb[6].mxu1 }
 0x129   :  { %224 = vst [vmem:[#allocation7 + $0x38] sm:$0xff] %v326_v52  ;;  %232 = vst [vmem:[#allocation7 + $0x78] sm:$0xff] %v338_v53  ;;  %v168_v54 = vpop.f32.mrb[7].mxu0  ;;  %v208_v55 = vpop.f32.mrb[7].mxu1 }
 0x12a   :  { %223 = vst [vmem:[#allocation7 + $0x30] sm:$0xff] %v168_v54  ;;  %231 = vst [vmem:[#allocation7 + $0x70] sm:$0xff] %v208_v55 }
 0x12b   :  { %447 = shalt.err (!%p444_p6)
}
 0x12c   :  { %s448_s10 = scalar_lea.hbm %s531_s2, 2048 }
 0x12d   :  { %p449_p7 = scmp.ne.s32.totalorder %s531_s2, %s448_s10  ;;  %p452_p8 = scmp.lt.u32.totalorder %s448_s10, %s531_s2 }
 0x12f   :  { %p454_p9 = pnand %p452_p8, %p449_p7 }
 0x131   :  { %457 = shalt.err (!%p454_p9)
}
 0x132   :  { %244 = dma.vmem_to_hbm [thread:$0]  %s239_s6, 2048, %s531_s2, [#allocation4], %s465_s19, %s465_s19, %s466_s20  }
 0x133   :  { %462 = dma.done.wait [#allocation4], 2048  }
 0x134   :  { %463 = vsyncadd [#allocation4], 4294965248 }
 0x135   :  { %248 = vsyncpa [#allocation3], 1 }
 0x136   :  { %249 = vsyncpa [#allocation6], 1 }
 0x137   :  { %250 = vsyncpa [#allocation4], 1 }

</bundles_post_ra>
